<compile_context>
chip_gen: v6e
topology: v6e:2x2x1
jax: 0.10.0
libtpu: 0.0.40
codegen_flags: <defaults>
</compile_context>

<pallas_src>
import functools
import math

import jax
import jax.numpy as jnp
import numpy as np
from jax.experimental import pallas as pl
from jax.experimental.pallas import tpu as pltpu


def _label_smoothed_kl_kernel(labels_ref, logits_ref, out_ref, *,
                              inv_temperature, on_val, off_val, xlogy_const,
                              padding_idx, n_rows, row_tile, steps_per_core,
                              max_in_input_dtype):
    i = pl.program_id(1)

    @pl.when(i == 0)
    def _():
        out_ref[...] = jnp.zeros_like(out_ref)

    x = logits_ref[...]                                          # (TN, K), input dtype
    if max_in_input_dtype:
        # max compares are exact in bf16; halves the max-pass VALU cost on v6e/v7x.
        mx = jnp.max(x, axis=-1, keepdims=True).astype(jnp.float32)
        x32 = x.astype(jnp.float32)
    else:
        x32 = x.astype(jnp.float32)
        mx = jnp.max(x32, axis=-1, keepdims=True)
    z = x32 - mx                                                 # (TN, K) f32, <= 0
    if inv_temperature != 1.0:                                   # compile-time skip at T == 1
        z = z * jnp.float32(inv_temperature)

    # One fused sweep over z for every K-wide reduction (softmax denom, row sum, label pick).
    sum_exp = jnp.sum(jnp.exp(z), axis=-1, keepdims=True)        # (TN, 1)
    labels = labels_ref[...]                                     # (TN, 1) int32
    col = jax.lax.broadcasted_iota(jnp.int32, z.shape, 1)        # (TN, K)
    z_lab = jnp.sum(jnp.where(col == labels, z, 0.0), axis=-1, keepdims=True)
    lse = jnp.log(sum_exp)                                       # (TN, 1)

    # sum_j t_j * logp_j, decomposed algebraically (t never materialized).  Assumes
    # padding_idx < K and that rows with label == padding_idx are fully masked below,
    # so the label-weight and padding-weight corrections never overlap.
    if off_val != 0.0:
        sum_z = jnp.sum(z, axis=-1, keepdims=True)
        z_pad = z[:, padding_idx:padding_idx + 1]                # static lane slice, (TN, 1)
        cross = (jnp.float32(off_val) * (sum_z - z_pad)
                 + jnp.float32(on_val - off_val) * z_lab - lse)
    else:
        cross = jnp.float32(on_val) * z_lab - lse

    # Row mask: padding rows plus rows past N (tail / clamped blocks read stale VMEM; any
    # NaN/Inf they produce is discarded ONLY because this is a select — never change this
    # to multiplicative masking).
    block = pl.program_id(0) * steps_per_core + i                # UNclamped block index
    row = block * row_tile + jax.lax.broadcasted_iota(jnp.int32, (row_tile, 1), 0)
    valid = jnp.logical_and(labels != padding_idx, row < n_rows)
    contrib = jnp.where(valid, jnp.float32(xlogy_const) - cross, jnp.float32(0.0))

    # Collapse the block to one scalar (XLU sublane reduce) -> a single tiny store instead
    # of row_tile/8 masked vst.msk partial stores per step.
    out_ref[...] += jnp.sum(contrib, axis=0, keepdims=True).reshape(1, 1, 1)


def _tpu_info():
    try:
        return pltpu.get_tpu_info()
    except Exception:
        return None


def _vmem_capacity_bytes(info):
    v = getattr(info, "vmem_capacity_bytes", None) if info is not None else None
    try:
        v = int(v)
    except (TypeError, ValueError):
        v = 0
    return v if v > 0 else 64 * 1024 * 1024      # conservative fallback (v7x per-TC VMEM)


def _num_tensorcores(info):
    for attr in ("num_cores", "num_tensorcores", "tensorcores_per_chip",
                 "cores_per_chip", "num_cores_per_chip", "core_count"):
        v = getattr(info, attr, None) if info is not None else None
        try:
            v = int(v)
        except (TypeError, ValueError):
            v = 0
        if v > 0:
            return min(v, 2)                     # no current TPU has >2 TensorCores/chip
    return 1                                     # v5e / v6e (single TC); safe v7x fallback


def _has_native_bf16_vpu():
    # v2-v5 VPUs have no bf16 lanes; only use input-dtype max on v6e / v7x.
    try:
        kind = jax.devices()[0].device_kind.lower()
    except Exception:
        return False
    return not any(t in kind for t in ("v2", "v3", "v4", "v5"))


def _auto_row_tile(n_rows, k, itemsize, align, per_core_vmem):
    # Size blocks by BYTES (not a row cap): per element budget the double-buffered input
    # (2 * itemsize) plus ~two live f32 intermediates (z, exp(z)) that the compiler keeps
    # around even for bf16 inputs, so the pipeline stays inside the per-core VMEM limit.
    per_elem_bytes = 2 * itemsize + 8
    target_bytes = min(max(per_core_vmem // 3, 2 * 1024 * 1024), 48 * 1024 * 1024)
    rt = target_bytes // max(1, k * per_elem_bytes)
    n_pad = -(-n_rows // align) * align          # no point exceeding (aligned) N
    rt = max(align, min(int(rt), n_pad))
    rt -= rt % align
    return int(max(align, rt))


def label_smoothed_loss(logits, labels, *, padding_idx,
                        smoothing_const=0.0, temperature_const=1.0, row_tile=None):
    """logits: (b, m, K) float (f32 or bf16), labels: (b, m) int. Returns (scalar loss, None)."""
    b, m, K = logits.shape
    N = b * m
    logits2d = logits.reshape(N, K)              # keep dtype: bf16 halves HBM traffic
    labels2d = labels.reshape(N, 1).astype(jnp.int32)

    itemsize = jnp.dtype(logits.dtype).itemsize
    align = 16 if itemsize < 4 else 8            # sublane tiling (bf16 packs 2 rows)

    info = _tpu_info()
    n_tc = _num_tensorcores(info)
    # Conservative on v7x: if >1 TC is reported, treat the reported VMEM as shared.
    per_core_vmem = max(_vmem_capacity_bytes(info) // n_tc, 8 * 1024 * 1024)

    if row_tile is None:
        row_tile = _auto_row_tile(N, K, itemsize, align, per_core_vmem)
    else:
        row_tile = int(-(-int(row_tile) // align) * align)

    n_blocks = -(-N // row_tile)
    n_cores = max(1, min(n_tc, n_blocks))        # 2-way split only on multi-TC chips
    steps = -(-n_blocks // n_cores)

    # Compile-time label-smoothing constants.  The PyTorch module requires K > 2 whenever
    # smoothing_const > 0 (it divides by K - 2); we only guard against the ZeroDivisionError.
    off_val = (smoothing_const / (K - 2)) if K > 2 else 0.0
    on_val = 1.0 - smoothing_const
    # sum_j t_j*log(t_j) for a valid row (padding column contributes 0*log0 = 0; assumes
    # padding_idx < K and label != padding_idx on unmasked rows — both hold by construction).
    xlogy_const = 0.0
    if on_val > 0.0:
        xlogy_const += on_val * math.log(on_val)
    if off_val > 0.0:
        xlogy_const += (K - 2) * off_val * math.log(off_val)

    kernel = functools.partial(
        _label_smoothed_kl_kernel,
        inv_temperature=float(1.0 / temperature_const),
        on_val=float(on_val),
        off_val=float(off_val),
        xlogy_const=float(xlogy_const),
        padding_idx=int(padding_idx),
        n_rows=int(N),
        row_tile=int(row_tile),
        steps_per_core=int(steps),
        max_in_input_dtype=bool(itemsize < 4 and _has_native_bf16_vpu()),
    )

    def row_block(c, i):
        # Clamp so an over-provisioned core never maps past the last block; clamped
        # duplicates are fully masked in-kernel via the (unclamped) row < N check.
        return (jnp.minimum(c * steps + i, n_blocks - 1), 0)

    vmem_limit = int(min(max(per_core_vmem * 3 // 4, 32 * 1024 * 1024), 100 * 1024 * 1024))

    out = pl.pallas_call(
        kernel,
        out_shape=jax.ShapeDtypeStruct((n_cores, 1, 1), jnp.float32),
        grid_spec=pltpu.PrefetchScalarGridSpec(
            num_scalar_prefetch=0,
            grid=(n_cores, steps),
            in_specs=[
                pl.BlockSpec((row_tile, 1), row_block),    # labels
                pl.BlockSpec((row_tile, K), row_block),    # logits
            ],
            out_specs=pl.BlockSpec((1, 1, 1), lambda c, i: (c, 0, 0)),
        ),
        compiler_params=pltpu.CompilerParams(
            dimension_semantics=("parallel", "arbitrary"),
            vmem_limit_bytes=vmem_limit,
        ),
    )(labels2d, logits2d)

    # Tiny final collapse (one scalar per core) done once, outside the kernel.
    return jnp.sum(out), None


def _reference(logits, labels, *, padding_idx, smoothing_const, temperature_const):
    b, m, K = logits.shape
    N = b * m
    x = (logits.astype(jnp.float32) / temperature_const).reshape(N, K)
    logp = jax.nn.log_softmax(x, axis=-1)
    flat_labels = labels.reshape(-1)
    t = jnp.full((N, K), smoothing_const / (K - 2), dtype=jnp.float32)
    t = t.at[jnp.arange(N), flat_labels].set(1.0 - smoothing_const)
    t = t.at[:, padding_idx].set(0.0)
    t = jnp.where((flat_labels != padding_idx)[:, None], t, 0.0)
    kl = jnp.where(t > 0.0, t * jnp.log(jnp.maximum(t, 1e-30)), 0.0) - t * logp
    return jnp.sum(kl)


# TODO(synk): the in-forward sanity assert / pdb debug path of the PyTorch module is
# host-side debugging and is intentionally not translated into the kernel.

if __name__ == "__main__":
    key = jax.random.PRNGKey(0)
    padding_idx = 0
    smoothing_const, temperature_const = 0.1, 2.0
    k1, k2, k3, k4, k5, k6 = jax.random.split(key, 6)

    # --- Test 1: small f32 case (shapes consistent with the module: b=2, m=8, K=32) ---
    b, m, K = 2, 8, 32
    logits = jax.random.normal(k1, (b, m, K), dtype=jnp.float32)
    labels = jax.random.randint(k2, (b, m), 0, K, dtype=jnp.int32)
    labels = labels.at[0, 0].set(padding_idx).at[1, 3].set(padding_idx)  # exercise row masking

    loss, _ = label_smoothed_loss(logits, labels, padding_idx=padding_idx,
                                  smoothing_const=smoothing_const,
                                  temperature_const=temperature_const)
    loss = jax.block_until_ready(loss)
    ref = jax.block_until_ready(_reference(logits, labels, padding_idx=padding_idx,
                                           smoothing_const=smoothing_const,
                                           temperature_const=temperature_const))
    assert np.isfinite(np.asarray(loss)), "non-finite loss (test 1)"
    assert np.allclose(np.asarray(loss), np.asarray(ref), rtol=1e-4, atol=1e-3), (loss, ref)

    # --- Test 2: bf16 logits, ragged N, forced small row_tile so the multi-block,
    #             multi-core-capable and clamped/masked-tail paths are all exercised ---
    b2, m2, K2 = 2, 37, 160
    logits2 = jax.random.normal(k3, (b2, m2, K2), dtype=jnp.float32).astype(jnp.bfloat16)
    labels2 = jax.random.randint(k4, (b2, m2), 0, K2, dtype=jnp.int32)
    labels2 = labels2.at[0, 5].set(padding_idx).at[1, 0].set(padding_idx)

    loss2, _ = label_smoothed_loss(logits2, labels2, padding_idx=padding_idx,
                                   smoothing_const=smoothing_const,
                                   temperature_const=temperature_const,
                                   row_tile=16)
    loss2 = jax.block_until_ready(loss2)
    ref2 = jax.block_until_ready(_reference(logits2, labels2, padding_idx=padding_idx,
                                            smoothing_const=smoothing_const,
                                            temperature_const=temperature_const))
    assert np.isfinite(np.asarray(loss2)), "non-finite loss (test 2)"
    assert np.allclose(np.asarray(loss2), np.asarray(ref2), rtol=5e-4, atol=2e-2), (loss2, ref2)

    # --- Test 3: larger K, f32, smoothing=0 and temperature=1 (exercises the off_val==0 and
    #             inv_temperature==1 compile-time branches + auto byte-sized tile), tight tol ---
    b3, m3, K3 = 2, 37, 512
    logits3 = jax.random.normal(k5, (b3, m3, K3), dtype=jnp.float32)
    labels3 = jax.random.randint(k6, (b3, m3), 0, K3, dtype=jnp.int32)
    labels3 = labels3.at[0, 2].set(padding_idx).at[1, 10].set(padding_idx)

    loss3, _ = label_smoothed_loss(logits3, labels3, padding_idx=padding_idx,
                                   smoothing_const=0.0, temperature_const=1.0)
    loss3 = jax.block_until_ready(loss3)
    ref3 = jax.block_until_ready(_reference(logits3, labels3, padding_idx=padding_idx,
                                            smoothing_const=0.0, temperature_const=1.0))
    assert np.isfinite(np.asarray(loss3)), "non-finite loss (test 3)"
    assert np.allclose(np.asarray(loss3), np.asarray(ref3), rtol=2e-4, atol=1e-2), (loss3, ref3)

    print("KERNEL_OK")
</pallas_src>

<mosaic_0001>
module attributes {stable_mosaic.version = 11 : i64} {
  func.func @_label_smoothed_kl_kernel(%arg0: i32, %arg1: i32, %arg2: memref<16x1xi32, #tpu.memory_space<vmem>>, %arg3: memref<16x32xf32, #tpu.memory_space<vmem>>, %arg4: memref<1x1x1xf32, #tpu.memory_space<vmem>>) attributes {dimension_semantics = [#tpu.dimension_semantics<parallel>, #tpu.dimension_semantics<arbitrary>], iteration_bounds = array<i64: 1, 1>, scalar_prefetch = 0 : i64, scratch_operands = 0 : i64, tpu.core_type = #tpu.core_type<tc>, window_params = [{transform_indices = @transform_0, window_bounds = array<i64: 16, 1>}, {transform_indices = @transform_1, window_bounds = array<i64: 16, 32>}, {transform_indices = @transform_2, window_bounds = array<i64: 1, 1, 1>}]} {
    %c0_i32 = arith.constant 0 : i32
    %0 = arith.cmpi eq, %arg1, %c0_i32 : i32
    %1 = arith.extui %0 : i1 to i32
    %c0_i32_0 = arith.constant 0 : i32
    %2 = arith.cmpi ne, %1, %c0_i32_0 : i32
    scf.if %2 {
      %cst_22 = arith.constant 0.000000e+00 : f32
      %53 = vector.broadcast %cst_22 : f32 to vector<1x1x1xf32>
      %c0_23 = arith.constant 0 : index
      %c0_24 = arith.constant 0 : index
      %c0_25 = arith.constant 0 : index
      %54 = vector.load %arg4[%c0_23, %c0_24, %c0_25] : memref<1x1x1xf32, #tpu.memory_space<vmem>>, vector<1x1x1xf32>
      tpu.vector_store %arg4[%c0_23, %c0_24, %c0_25], %53 {strides = array<i32>} : memref<1x1x1xf32, #tpu.memory_space<vmem>>, vector<1x1x1xf32>,
    } else {
    }
    %c0 = arith.constant 0 : index
    %c0_1 = arith.constant 0 : index
    %3 = vector.load %arg3[%c0, %c0_1] : memref<16x32xf32, #tpu.memory_space<vmem>>, vector<16x32xf32>
    %cst = arith.constant dense<0xFF800000> : vector<16xf32>
    %4 = vector.multi_reduction <maximumf>, %3, %cst [1] : vector<16x32xf32> to vector<16xf32>
    %5 = vector.shape_cast %4 : vector<16xf32> to vector<16x1xf32>
    %6 = vector.broadcast %5 : vector<16x1xf32> to vector<16x32xf32>
    %7 = arith.subf %3, %6 : vector<16x32xf32>
    %cst_2 = arith.constant 5.000000e-01 : f32
    %8 = vector.broadcast %cst_2 : f32 to vector<16x32xf32>
    %9 = arith.mulf %7, %8 : vector<16x32xf32>
    %10 = math.exp %9 : vector<16x32xf32>
    %cst_3 = arith.constant dense<0.000000e+00> : vector<16xf32>
    %11 = vector.multi_reduction <add>, %10, %cst_3 [1] : vector<16x32xf32> to vector<16xf32>
    %12 = vector.shape_cast %11 : vector<16xf32> to vector<16x1xf32>
    %c0_4 = arith.constant 0 : index
    %c0_5 = arith.constant 0 : index
    %13 = vector.load %arg2[%c0_4, %c0_5] : memref<16x1xi32, #tpu.memory_space<vmem>>, vector<16x1xi32>
    %14 = tpu.iota {dimensions = array<i32: 1>} : vector<16x32xi32>
    %15 = vector.broadcast %13 : vector<16x1xi32> to vector<16x32xi32>
    %16 = arith.cmpi eq, %14, %15 : vector<16x32xi32>
    %cst_6 = arith.constant 0.000000e+00 : f32
    %17 = vector.broadcast %cst_6 : f32 to vector<16x32xf32>
    %18 = arith.select %16, %9, %17 : vector<16x32xi1>, vector<16x32xf32>
    %cst_7 = arith.constant dense<0.000000e+00> : vector<16xf32>
    %19 = vector.multi_reduction <add>, %18, %cst_7 [1] : vector<16x32xf32> to vector<16xf32>
    %20 = vector.shape_cast %19 : vector<16xf32> to vector<16x1xf32>
    %21 = math.log %12 : vector<16x1xf32>
    %cst_8 = arith.constant dense<0.000000e+00> : vector<16xf32>
    %22 = vector.multi_reduction <add>, %9, %cst_8 [1] : vector<16x32xf32> to vector<16xf32>
    %23 = vector.shape_cast %22 : vector<16xf32> to vector<16x1xf32>
    %24 = vector.extract_strided_slice %9 {offsets = [0, 0], sizes = [16, 1], strides = [1, 1]} : vector<16x32xf32> to vector<16x1xf32>
    %25 = arith.subf %23, %24 : vector<16x1xf32>
    %cst_9 = arith.constant 0.00333333341 : f32
    %26 = vector.broadcast %cst_9 : f32 to vector<16x1xf32>
    %27 = arith.mulf %26, %25 : vector<16x1xf32>
    %cst_10 = arith.constant 0.896666646 : f32
    %28 = vector.broadcast %cst_10 : f32 to vector<16x1xf32>
    %29 = arith.mulf %28, %20 : vector<16x1xf32>
    %30 = arith.addf %27, %29 : vector<16x1xf32>
    %31 = arith.subf %30, %21 : vector<16x1xf32>
    %c1_i32 = arith.constant 1 : i32
    %32 = arith.muli %arg0, %c1_i32 : i32
    %33 = arith.addi %32, %arg1 : i32
    %c16_i32 = arith.constant 16 : i32
    %34 = arith.muli %33, %c16_i32 : i32
    %35 = tpu.iota {dimensions = array<i32: 0>} : vector<16x1xi32>
    %36 = vector.broadcast %34 : i32 to vector<16x1xi32>
    %37 = arith.addi %36, %35 : vector<16x1xi32>
    %c0_i32_11 = arith.constant 0 : i32
    %38 = vector.broadcast %c0_i32_11 : i32 to vector<16x1xi32>
    %39 = arith.cmpi ne, %13, %38 : vector<16x1xi32>
    %c16_i32_12 = arith.constant 16 : i32
    %40 = vector.broadcast %c16_i32_12 : i32 to vector<16x1xi32>
    %41 = arith.cmpi slt, %37, %40 : vector<16x1xi32>
    %42 = arith.andi %39, %41 : vector<16x1xi1>
    %cst_13 = arith.constant -0.665202737 : f32
    %43 = vector.broadcast %cst_13 : f32 to vector<16x1xf32>
    %44 = arith.subf %43, %31 : vector<16x1xf32>
    %cst_14 = arith.constant 0.000000e+00 : f32
    %45 = vector.broadcast %cst_14 : f32 to vector<16x1xf32>
    %46 = arith.select %42, %44, %45 : vector<16x1xi1>, vector<16x1xf32>
    %c0_15 = arith.constant 0 : index
    %c0_16 = arith.constant 0 : index
    %c0_17 = arith.constant 0 : index
    %47 = vector.load %arg4[%c0_15, %c0_16, %c0_17] : memref<1x1x1xf32, #tpu.memory_space<vmem>>, vector<1x1x1xf32>
    %cst_18 = arith.constant dense<0.000000e+00> : vector<1xf32>
    %48 = vector.multi_reduction <add>, %46, %cst_18 [0] : vector<16x1xf32> to vector<1xf32>
    %49 = vector.shape_cast %48 : vector<1xf32> to vector<1x1xf32>
    %50 = vector.shape_cast %49 : vector<1x1xf32> to vector<1x1x1xf32>
    %51 = arith.addf %47, %50 : vector<1x1x1xf32>
    %c0_19 = arith.constant 0 : index
    %c0_20 = arith.constant 0 : index
    %c0_21 = arith.constant 0 : index
    %52 = vector.load %arg4[%c0_19, %c0_20, %c0_21] : memref<1x1x1xf32, #tpu.memory_space<vmem>>, vector<1x1x1xf32>
    tpu.vector_store %arg4[%c0_19, %c0_20, %c0_21], %51 {strides = array<i32>} : memref<1x1x1xf32, #tpu.memory_space<vmem>>, vector<1x1x1xf32>,
    return
  }
  func.func @transform_0(%arg0: i32, %arg1: i32) -> (i32, i32) {
    %c1_i32 = arith.constant 1 : i32
    %0 = arith.muli %arg0, %c1_i32 : i32
    %1 = arith.addi %0, %arg1 : i32
    %c0_i32 = arith.constant 0 : i32
    %2 = arith.minsi %1, %c0_i32 : i32
    %c0_i32_0 = arith.constant 0 : i32
    %c0_i32_1 = arith.constant 0 : i32
    return %2, %c0_i32_0 : i32, i32
  }
  func.func @transform_1(%arg0: i32, %arg1: i32) -> (i32, i32) {
    %c1_i32 = arith.constant 1 : i32
    %0 = arith.muli %arg0, %c1_i32 : i32
    %1 = arith.addi %0, %arg1 : i32
    %c0_i32 = arith.constant 0 : i32
    %2 = arith.minsi %1, %c0_i32 : i32
    %c0_i32_0 = arith.constant 0 : i32
    %c0_i32_1 = arith.constant 0 : i32
    return %2, %c0_i32_0 : i32, i32
  }
  func.func @transform_2(%arg0: i32, %arg1: i32) -> (i32, i32, i32) {
    %c0_i32 = arith.constant 0 : i32
    %c0_i32_0 = arith.constant 0 : i32
    %c0_i32_1 = arith.constant 0 : i32
    return %arg0, %c0_i32, %c0_i32_0 : i32, i32, i32
  }
}

</mosaic_0001>

<bundles_post_ra>
// kernel: tpu_custom_call.1
= control target key start
LH: loop header
LB: loop body
LE: loop exit
PB: predicated region body
PF: predicated region fallthrough
CT: control target
= control target key end

     0   :  { %vm84_vm0 = vcmask 261120   ;;  %v238_v4 = vmov 0   ;;  %s289_s0 = inlined_call_operand.vmem [shape: s32[16,1], index: 0, kind: input, shape index: {}]   ;;  %s290_s1 = inlined_call_operand.vmem [shape: f32[16,32], index: 1, kind: input, shape index: {}]   ;;  %s291_s2 = inlined_call_operand.hbm [shape: f32[1,1,1], index: 2, kind: output, shape index: {}]  }
   0x1   :  { %v82_v0 = vld [vmem:[%s290_s1] sm:$0xff]  ;;  %v83_v1 = vld [vmem:[%s290_s1 + $0x8] sm:$0xff]  ;;  %206 = vset.pattern.permute.xlu1 %v238_v4  ;;  %207 = vset.pattern.permute.xlu0 %v238_v4 }
   0x2   :  { %v265_v2 = vld [vmem:[%s289_s0] sm:$0xff]  ;;  %v85_v3 = vsel %vm84_vm0, %v82_v0, -inf }
   0x3   :  { %7 = vsyncpa [#allocation3], 0  ;;  %86 = vmax.xlane.f32.xlu0 %v85_v3  ;;  %110 = vperm.xlu1 %206, %v265_v2   ;;  %v88_v5 = vsel %vm84_vm0, %v83_v1, -inf  ;;  %v273_v6 = vld [vmem:[%s289_s0 + $0x8] sm:$0xff]  ;;  %v107_v15 = vlaneseq  ;;  %vm80_vm3 = vcmask 0   ;;  %v239_v29 = vmov 0.0  }
   0x4   :  { %81 = vst.msk [vmem:[#allocation2] sm:$0x1] %vm80_vm3, %v239_v29  ;;  %vm153_vm4 = vcmp.ne.s32.totalorder %v265_v2, 0  ;;  %vm154_vm5 = vcmp.ne.s32.totalorder %v273_v6, 0  ;;  %vm164_vm6 = vcmask 7168   ;;  %s240_s0 = smov [#allocation2]  }
   0x5   :  { %v108_v19 = vand.u32 127, %v107_v15  ;;  %s183_s1 = sshll.u32 %s240_s0, 4  ;;  %s184_s1 = int_to_ptr.vmem [resolvable:$true] %s183_s1 }
   0x6   :  { %s216_s17 = scalar_lea.vmem %s184_s1, 16  ;;  %s220_s18 = scalar_lea.vmem %s184_s1, 32 }
   0x7   :  { %89 = vmax.xlane.f32.xlu0 %v88_v5  ;;  %113 = vperm.xlu1 %206, %v273_v6   ;;  %p217_p0 = scmp.ne.s32.totalorder %s184_s1, %s216_s17  ;;  %p221_p1 = scmp.lt.s32.totalorder %s184_s1, %s184_s1 }
   0x8   :  { %p222_p2 = scmp.lt.s32.totalorder %s220_s18, %s216_s17 }
   0xa   :  { %p223_p3 = por %p222_p2, %p221_p1 }
   0xb   :  { %v163_v62 = vld [vmem:[#allocation2] sm:$0x1] }
   0xc   :  { %p224_p4 = pnand %p223_p3, %p217_p0 }
  0x7e   :  { %v111_v18 = vpop.permute.xlu1 %110 }
  0x7f   :  { %vm115_vm1 = vcmp.eq.s32.totalorder %v108_v19, %v111_v18 }
  0x82   :  { %v114_v23 = vpop.permute.xlu1 %113 }
  0x83   :  { %vm116_vm2 = vcmp.eq.s32.totalorder %v108_v19, %v114_v23 }
  0x8c   :  { %v87_v7 = vpop.xlane.xlu0 %86 }
  0x8d   :  { %v91_v8 = vsub.f32 %v82_v0, %v87_v7 }
  0x8f   :  { %v93_v9 = vmul.f32 0.5, %v91_v8 }
  0x90   :  { %v90_v10 = vpop.xlane.xlu0 %89 }
  0x91   :  { %v95_v11 = vmul.f32 1.442695, %v93_v9  ;;  %v92_v12 = vsub.f32 %v83_v1, %v90_v10  ;;  %v129_v21 = vsel %vm84_vm0, %v93_v9, 0.0  ;;  %v117_v25 = vsel %vm115_vm1, %v93_v9, 0.0 }
  0x92   :  { %v119_v26 = vsel %vm84_vm0, %v117_v25, 0.0 }
  0x93   :  { %208 = vpow2.f32 %v95_v11  ;;  %v94_v13 = vmul.f32 0.5, %v92_v12 }
  0x95   :  { %v97_v14 = vmul.f32 1.442695, %v94_v13  ;;  %v132_v24 = vsel %vm84_vm0, %v94_v13, 0.0  ;;  %v118_v27 = vsel %vm116_vm2, %v94_v13, 0.0 }
  0x96   :  { %v122_v28 = vsel %vm84_vm0, %v118_v27, 0.0 }
  0x97   :  { %210 = vpow2.f32 %v97_v14 }
  0xa0   :  { %v209_v16 = vpop.eup %208 }
  0xa1   :  { %v99_v17 = vsel %vm84_vm0, %v209_v16, 0.0 }
  0xa2   :  { %100 = vadd.xlane.f32.xlu0 %v99_v17 }
  0xa4   :  { %v211_v20 = vpop.eup %210 }
  0xa5   :  { %v102_v22 = vsel %vm84_vm0, %v211_v20, 0.0 }
  0xa6   :  { %130 = vadd.xlane.f32.xlu0 %v129_v21  ;;  %103 = vadd.xlane.f32.xlu1 %v102_v22 }
  0xaa   :  { %133 = vadd.xlane.f32.xlu0 %v132_v24 }
  0xae   :  { %120 = vadd.xlane.f32.xlu0 %v119_v26 }
  0xb2   :  { %123 = vadd.xlane.f32.xlu0 %v122_v28 }
 0x12b   :  { %v101_v30 = vpop.xlane.xlu0 %100 }
 0x12c   :  { %212 = vlog2.f32 %v101_v30 }
 0x12f   :  { %v104_v31 = vpop.xlane.xlu1 %103  ;;  %v131_v32 = vpop.xlane.xlu0 %130 }
 0x130   :  { %214 = vlog2.f32 %v104_v31  ;;  %v135_v34 = vsub.f32 %v131_v32, %v93_v9 }
 0x132   :  { %v137_v36 = vmul.f32 0.0033333334, %v135_v34 }
 0x133   :  { %v134_v33 = vpop.xlane.xlu0 %133 }
 0x134   :  { %v136_v37 = vsub.f32 %v134_v33, %v94_v13 }
 0x136   :  { %v138_v43 = vmul.f32 0.0033333334, %v136_v37 }
 0x137   :  { %v121_v35 = vpop.xlane.xlu0 %120 }
 0x138   :  { %v139_v38 = vmul.f32 0.89666665, %v121_v35 }
 0x139   :  { %v213_v39 = vpop.eup %212 }
 0x13a   :  { %v126_v40 = vmul.f32 0.6931472, %v213_v39  ;;  %v141_v41 = vadd.f32 %v139_v38, %v137_v36 }
 0x13b   :  { %v124_v42 = vpop.xlane.xlu0 %123 }
 0x13c   :  { %v143_v44 = vsub.f32 %v141_v41, %v126_v40  ;;  %v140_v45 = vmul.f32 0.89666665, %v124_v42 }
 0x13d   :  { %v215_v46 = vpop.eup %214 }
 0x13e   :  { %v128_v47 = vmul.f32 0.6931472, %v215_v46  ;;  %v159_v48 = vsub.f32 -0.66520274, %v143_v44  ;;  %v142_v49 = vadd.f32 %v140_v45, %v138_v43 }
 0x140   :  { %v144_v50 = vsub.f32 %v142_v49, %v128_v47  ;;  %v161_v51 = vsel %vm153_vm4, %v159_v48, 0.0 }
 0x141   :  { %v165_v54 = vsel %vm164_vm6, %v161_v51, 0.0 }
 0x142   :  { %v160_v52 = vsub.f32 -0.66520274, %v144_v50 }
 0x144   :  { %v162_v53 = vsel %vm154_vm5, %v160_v52, 0.0 }
 0x145   :  { %v166_v55 = vsel %vm164_vm6, %v162_v53, 0.0 }
 0x146   :  { %v167_v56 = vadd.f32 %v166_v55, %v165_v54 }
 0x148   :  { %v168_v57 = vrot.slane %v167_v56, 4 }
 0x14a   :  { %v169_v58 = vadd.f32 %v168_v57, %v167_v56 }
 0x14c   :  { %v170_v59 = vrot.slane %v169_v58, 2 }
 0x14e   :  { %v171_v60 = vadd.f32 %v170_v59, %v169_v58 }
 0x150   :  { %v172_v61 = vrot.slane %v171_v60, 1 }
 0x152   :  { %v173_v63 = vadd.f32 %v172_v61, %v171_v60 }
 0x154   :  { %v174_v0 = vadd.f32 %v173_v63, %v163_v62 }
 0x156   :  { %176 = vst.msk [vmem:[#allocation2] sm:$0x1] %vm80_vm3, %v174_v0 }
 0x157   :  { %227 = shalt.err (!%p224_p4)
}
 0x158   :  { %186 = dma.vmem_to_hbm [thread:$0]  %s184_s1, 16, %s291_s2, [#allocation3]  }
 0x159   :  { %236 = dma.done.wait [#allocation3], 16  }
 0x15a   :  { %237 = vsyncadd [#allocation3], 4294967280 }
 0x15b   :  { %190 = vsyncpa [#allocation3], 1 }

</bundles_post_ra>
